<compile_context>
chip_gen: v6e
topology: v6e:2x2x1
jax: 0.10.0
libtpu: 0.0.40
codegen_flags: <defaults>
</compile_context>

<pallas_src>
import functools

import jax
import jax.numpy as jnp
from jax.experimental import pallas as pl
from jax.experimental.pallas import tpu as pltpu


def _round_up(n, m):
    return ((n + m - 1) // m) * m


# Explicit scoped-VMEM budget (re-derive for v7x's 64 MiB if tile/C/L grow).
_VMEM_LIMIT_BYTES = 48 * 1024 * 1024


# --------------------------------------------------------------------------
# Kernel 1: input 1x1 conv (dim -> C), tiled over (batch, time tile).
# Hoisted out of the fused stage so the big `dim` never enters its working set.
# --------------------------------------------------------------------------
def _input_proj_kernel(x_ref, w_ref, b_ref, o_ref):
    x = x_ref[0].astype(jnp.bfloat16)                    # cast only at the MXU input
    y = jnp.dot(x, w_ref[...], preferred_element_type=jnp.float32) + b_ref[...]
    o_ref[0] = y.astype(o_ref.dtype)


# --------------------------------------------------------------------------
# Kernel 2: fused dilated-residual stage + output 1x1 conv on one (b, T-tile).
# The time tile carries a `halo` of rows on each side so every dilated conv
# sees its full receptive field; per-layer Conv1d zero padding is reproduced
# with pltpu.roll + masks keyed on the *global* (sequence) row index.
# --------------------------------------------------------------------------
def _stage_kernel(ap_ref, ac_ref, an_ref,            # act0 blocks: prev/cur/next
                  mp_ref, mc_ref, mn_ref,             # mask blocks: prev/cur/next
                  wd_ref, bd_ref, w1_ref, b1_ref,     # stacked per-layer weights
                  scale_ref, shift_ref,               # folded BatchNorm (eval)
                  wo_ref, bo_ref,                     # output 1x1 conv (lane padded)
                  o_ref,
                  win_ref, mwin_ref,                  # VMEM scratch windows
                  *, dilations, tile, halo, seq_len):
    W = tile + 2 * halo
    ti = pl.program_id(1)

    # Assemble the haloed window [prev tail | current tile | next head].
    win_ref[pl.ds(0, halo), :] = ap_ref[0, pl.ds(tile - halo, halo), :]
    win_ref[pl.ds(halo, tile), :] = ac_ref[0]
    win_ref[pl.ds(halo + tile, halo), :] = an_ref[0, pl.ds(0, halo), :]
    mwin_ref[pl.ds(0, halo), :] = mp_ref[0, pl.ds(tile - halo, halo), :]
    mwin_ref[pl.ds(halo, tile), :] = mc_ref[0]
    mwin_ref[pl.ds(halo + tile, halo), :] = mn_ref[0, pl.ds(0, halo), :]

    act = win_ref[...]                                 # (W, C) resident f32
    mwin = mwin_ref[...]                               # (W, 1) f32

    # Global sequence index of each window row; the tap masks below make tile
    # edges behave exactly like Conv1d(padding=d) zero padding.
    g = jax.lax.broadcasted_iota(jnp.int32, (W, 1), 0) + (ti * tile - halo)

    # TODO(synk): for very deep stages the fully unrolled loop may spill; switch
    # to lax.fori_loop with dynamic wd_ref[li] indexing if the bundle shows it.
    for li, d in enumerate(dilations):
        a16 = act.astype(jnp.bfloat16)
        # 3-tap dilated conv as three (W,C)@(C,C) matmuls (no lane-offset slices).
        y_prev = jnp.dot(a16, wd_ref[li, 0], preferred_element_type=jnp.float32)
        y_mid = jnp.dot(a16, wd_ref[li, 1], preferred_element_type=jnp.float32)
        y_next = jnp.dot(a16, wd_ref[li, 2], preferred_element_type=jnp.float32)

        left = pltpu.roll(y_prev, shift=d, axis=0)      # row t <- y_prev[t - d]
        left = jnp.where(g >= d, left, 0.0)             # zero pad at sequence start
        right = pltpu.roll(y_next, shift=W - d, axis=0)  # row t <- y_next[t + d]
        right = jnp.where(g < seq_len - d, right, 0.0)  # zero pad at sequence end

        h = jnp.maximum(left + y_mid + right + bd_ref[li], 0.0)          # F.relu
        z = (jnp.dot(h.astype(jnp.bfloat16), w1_ref[li],
                     preferred_element_type=jnp.float32) + b1_ref[li])   # 1x1 conv
        z = jnp.where(z >= 0.0, z, 0.2 * z)                              # LeakyReLU(0.2)
        z = z * scale_ref[li] + shift_ref[li]                            # BatchNorm (eval)
        # TODO(synk): Dropout(0.5) / batch-statistic BatchNorm only apply in
        # training mode; eval mode (identity dropout, running stats) is used here.
        act = (act + z) * mwin                                            # residual * mask

    # Output 1x1 conv on the tile interior only (class dim padded to 128 lanes).
    ctr = act[halo:halo + tile, :].astype(jnp.bfloat16)
    out = jnp.dot(ctr, wo_ref[...], preferred_element_type=jnp.float32) + bo_ref[...]
    o_ref[0] = (out * mwin[halo:halo + tile, :]).astype(o_ref.dtype)


# --------------------------------------------------------------------------
# Wrapper
# --------------------------------------------------------------------------
def single_stage_model(x, mask, params, *, tile=128, eps=1e-5):
    """x: (B, T, dim) f32, mask: (B, T) f32 -> (B, T, num_classes) f32."""
    B, T, dim = x.shape
    layers = params["layers"]
    L = len(layers)
    C = params["w_in"].shape[1]
    num_classes = params["w_out"].shape[1]
    cout_pad = _round_up(max(num_classes, 128), 128)
    dilations = tuple(2 ** i for i in range(L))

    halo = _round_up(sum(dilations), 8)     # receptive-field half-width, 8-aligned
    # TODO(synk): for very deep stages (halo > tile) split the layer stack into
    # two pallas_calls at a mid-layer boundary instead of growing the halo.
    assert halo <= tile, "halo exceeds tile; raise tile or split the stage"
    assert tile % 8 == 0
    n_t = -(-T // tile)
    T_r = n_t * tile
    W = tile + 2 * halo

    if T_r != T:
        x = jnp.pad(x, ((0, 0), (0, T_r - T), (0, 0)))
        mask = jnp.pad(mask, ((0, 0), (0, T_r - T)))
    mask3 = mask[:, :, None].astype(jnp.float32)

    # ---- parameters: bf16 matmul weights, f32 biases / folded BatchNorm ------
    w_in = params["w_in"].astype(jnp.bfloat16)
    b_in = params["b_in"].reshape(1, C).astype(jnp.float32)
    wd = jnp.stack([lp["wd"] for lp in layers]).astype(jnp.bfloat16)      # (L,3,C,C)
    bd = jnp.stack([lp["bd"] for lp in layers])[:, None, :]               # (L,1,C)
    w1 = jnp.stack([lp["w1"] for lp in layers]).astype(jnp.bfloat16)      # (L,C,C)
    b1 = jnp.stack([lp["b1"] for lp in layers])[:, None, :]               # (L,1,C)

    gamma = jnp.stack([lp["gamma"] for lp in layers])
    beta = jnp.stack([lp["beta"] for lp in layers])
    mean = jnp.stack([lp["mean"] for lp in layers])
    var = jnp.stack([lp["var"] for lp in layers])
    inv = jax.lax.rsqrt(var + eps)
    bn_scale = (gamma * inv)[:, None, :]                                  # (L,1,C)
    bn_shift = (beta - mean * gamma * inv)[:, None, :]                    # (L,1,C)

    # Lane-dense output head: zero-pad the class dim to a multiple of 128 so the
    # wrapper slice below is exact.
    w_out = (jnp.zeros((C, cout_pad), jnp.float32)
             .at[:, :num_classes].set(params["w_out"]).astype(jnp.bfloat16))
    b_out = jnp.zeros((1, cout_pad), jnp.float32).at[0, :num_classes].set(params["b_out"])

    # ---- kernel 1: input projection (dim -> C), tiled over (B, T) ------------
    act0 = pl.pallas_call(
        _input_proj_kernel,
        out_shape=jax.ShapeDtypeStruct((B, T_r, C), jnp.float32),
        grid=(B, n_t),
        in_specs=[
            pl.BlockSpec((1, tile, dim), lambda b, t: (b, t, 0)),
            pl.BlockSpec((dim, C), lambda b, t: (0, 0)),
            pl.BlockSpec((1, C), lambda b, t: (0, 0)),
        ],
        out_specs=pl.BlockSpec((1, tile, C), lambda b, t: (b, t, 0)),
        compiler_params=pltpu.CompilerParams(
            dimension_semantics=("parallel", "parallel"),
            vmem_limit_bytes=_VMEM_LIMIT_BYTES),
        cost_estimate=pl.CostEstimate(
            flops=int(2 * B * T_r * dim * C), transcendentals=0,
            bytes_accessed=int(4 * B * T_r * (dim + C) + 2 * dim * C + 4 * C)),
    )(x, w_in, b_in)

    # ---- kernel 2: fused dilated-residual stage + output head ----------------
    kern = functools.partial(_stage_kernel, dilations=dilations, tile=tile,
                             halo=halo, seq_len=T)
    prev_map = lambda b, t: (b, jnp.maximum(t - 1, 0), 0)
    cur_map = lambda b, t: (b, t, 0)
    next_map = lambda b, t: (b, jnp.minimum(t + 1, n_t - 1), 0)
    act_spec = lambda m: pl.BlockSpec((1, tile, C), m)
    msk_spec = lambda m: pl.BlockSpec((1, tile, 1), m)

    def rep(shape):
        zeros = (0,) * len(shape)
        return pl.BlockSpec(shape, lambda b, t: zeros)

    stage_flops = int(B * n_t * (8 * L * C * C * W + 2 * C * cout_pad * tile))
    stage_bytes = int(B * n_t * 4 * (3 * tile * C + 3 * tile + tile * cout_pad)
                      + 2 * (wd.size + w1.size + w_out.size)
                      + 4 * (bd.size + b1.size + bn_scale.size + bn_shift.size
                             + b_out.size))

    out = pl.pallas_call(
        kern,
        out_shape=jax.ShapeDtypeStruct((B, T_r, cout_pad), jnp.float32),
        grid=(B, n_t),
        in_specs=[
            act_spec(prev_map), act_spec(cur_map), act_spec(next_map),
            msk_spec(prev_map), msk_spec(cur_map), msk_spec(next_map),
            rep((L, 3, C, C)), rep((L, 1, C)), rep((L, C, C)), rep((L, 1, C)),
            rep((L, 1, C)), rep((L, 1, C)),
            rep((C, cout_pad)), rep((1, cout_pad)),
        ],
        out_specs=pl.BlockSpec((1, tile, cout_pad), lambda b, t: (b, t, 0)),
        scratch_shapes=[pltpu.VMEM((W, C), jnp.float32),
                        pltpu.VMEM((W, 1), jnp.float32)],
        compiler_params=pltpu.CompilerParams(
            dimension_semantics=("parallel", "parallel"),
            vmem_limit_bytes=_VMEM_LIMIT_BYTES),
        cost_estimate=pl.CostEstimate(flops=stage_flops, transcendentals=0,
                                      bytes_accessed=stage_bytes),
    )(act0, act0, act0, mask3, mask3, mask3,
      wd, bd, w1, b1, bn_scale, bn_shift, w_out, b_out)

    return out[:, :T, :num_classes]


# --------------------------------------------------------------------------
# Deterministic parameter init (synthetic; matches module __init__ shapes)
# --------------------------------------------------------------------------
def init_params(key, num_layers, num_f_maps, dim, num_classes):
    def norm(k, shape, scale):
        return scale * jax.random.normal(k, shape, dtype=jnp.float32)

    keys = iter(jax.random.split(key, 4 + 4 * num_layers))
    params = {
        "w_in": norm(next(keys), (dim, num_f_maps), dim ** -0.5),
        "b_in": norm(next(keys), (num_f_maps,), 0.1),
        "w_out": norm(next(keys), (num_f_maps, num_classes), num_f_maps ** -0.5),
        "b_out": norm(next(keys), (num_classes,), 0.1),
        "layers": [],
    }
    for _ in range(num_layers):
        params["layers"].append({
            "wd": norm(next(keys), (3, num_f_maps, num_f_maps), (3 * num_f_maps) ** -0.5),
            "bd": norm(next(keys), (num_f_maps,), 0.1),
            "w1": norm(next(keys), (num_f_maps, num_f_maps), num_f_maps ** -0.5),
            "b1": norm(next(keys), (num_f_maps,), 0.1),
            "gamma": jnp.ones((num_f_maps,), jnp.float32),
            "beta": jnp.zeros((num_f_maps,), jnp.float32),
            "mean": jnp.zeros((num_f_maps,), jnp.float32),
            "var": jnp.ones((num_f_maps,), jnp.float32),
        })
    return params


# --------------------------------------------------------------------------
# Pure-JAX reference (same channels-last layout) for correctness check.
# matmul_dtype lets us build a bf16-matmul reference matching the kernel's
# mixed precision for a tight comparison, plus a pure-f32 reference.
# --------------------------------------------------------------------------
def reference_forward(x, mask, params, eps=1e-5, matmul_dtype=jnp.float32):
    def mm(a, w):
        return jnp.dot(a.astype(matmul_dtype), w.astype(matmul_dtype),
                       preferred_element_type=jnp.float32)

    m = mask[:, :, None]
    out = mm(x, params["w_in"]) + params["b_in"]
    B, T, C = out.shape
    for i, lp in enumerate(params["layers"]):
        d = 2 ** i
        xp = jnp.pad(out, ((0, 0), (d, d), (0, 0)))
        h = (mm(xp[:, 0:T], lp["wd"][0]) + mm(xp[:, d:d + T], lp["wd"][1])
             + mm(xp[:, 2 * d:2 * d + T], lp["wd"][2]) + lp["bd"])
        h = jnp.maximum(h, 0.0)
        y = mm(h, lp["w1"]) + lp["b1"]
        y = jnp.where(y >= 0.0, y, 0.2 * y)
        y = (y - lp["mean"]) / jnp.sqrt(lp["var"] + eps) * lp["gamma"] + lp["beta"]
        out = (out + y) * m
    return (mm(out, params["w_out"]) + params["b_out"]) * m


# --------------------------------------------------------------------------
if __name__ == "__main__":
    B, T = 2, 200                      # T not a multiple of tile -> exercises padding
    num_layers, num_f_maps, dim, num_classes = 3, 32, 16, 10

    key = jax.random.PRNGKey(0)
    kx, km, kp = jax.random.split(key, 3)
    x = jax.random.normal(kx, (B, T, dim), dtype=jnp.float32)
    mask = (jax.random.uniform(km, (B, T)) > 0.2).astype(jnp.float32)
    params = init_params(kp, num_layers, num_f_maps, dim, num_classes)

    out = single_stage_model(x, mask, params, tile=128)   # 2 time tiles + halo
    out = jax.block_until_ready(out)

    assert out.shape == (B, T, num_classes)
    # Tight check vs a reference with the same bf16-input / f32-accumulate matmuls.
    ref_bf16 = reference_forward(x, mask, params, matmul_dtype=jnp.bfloat16)
    err_bf16 = float(jnp.max(jnp.abs(out - ref_bf16)))
    assert err_bf16 < 3e-2, f"mismatch vs bf16-matmul reference: {err_bf16}"
    # Loose check vs the pure-f32 reference (bounds total bf16 rounding).
    ref_f32 = reference_forward(x, mask, params)
    err_f32 = float(jnp.max(jnp.abs(out - ref_f32)))
    assert err_f32 < 2e-1, f"mismatch vs f32 reference: {err_f32}"

    print("KERNEL_OK")
</pallas_src>

<mosaic_0001>
module attributes {stable_mosaic.version = 11 : i64} {
  func.func @_input_proj_kernel(%arg0: i32, %arg1: i32, %arg2: memref<1x128x16xf32, #tpu.memory_space<vmem>>, %arg3: memref<16x32xbf16, #tpu.memory_space<vmem>>, %arg4: memref<1x32xf32, #tpu.memory_space<vmem>>, %arg5: memref<1x128x32xf32, #tpu.memory_space<vmem>>) attributes {dimension_semantics = [#tpu.dimension_semantics<parallel>, #tpu.dimension_semantics<parallel>], iteration_bounds = array<i64: 2, 2>, scalar_prefetch = 0 : i64, scratch_operands = 0 : i64, tpu.core_type = #tpu.core_type<tc>, window_params = [{transform_indices = @transform_0, window_bounds = array<i64: 1, 128, 16>}, {pipeline_mode = #tpu.pipeline_mode<synchronous>, transform_indices = @transform_1, window_bounds = array<i64: 16, 32>}, {pipeline_mode = #tpu.pipeline_mode<synchronous>, transform_indices = @transform_2, window_bounds = array<i64: 1, 32>}, {transform_indices = @transform_3, window_bounds = array<i64: 1, 128, 32>}]} {
    %c0 = arith.constant 0 : index
    %c0_0 = arith.constant 0 : index
    %c0_1 = arith.constant 0 : index
    %0 = vector.load %arg2[%c0, %c0_0, %c0_1] : memref<1x128x16xf32, #tpu.memory_space<vmem>>, vector<1x128x16xf32>
    %1 = vector.shape_cast %0 : vector<1x128x16xf32> to vector<128x16xf32>
    %2 = arith.truncf %1 : vector<128x16xf32> to vector<128x16xbf16>
    %c0_2 = arith.constant 0 : index
    %c0_3 = arith.constant 0 : index
    %3 = vector.load %arg3[%c0_2, %c0_3] : memref<16x32xbf16, #tpu.memory_space<vmem>>, vector<16x32xbf16>
    %cst = arith.constant dense<0.000000e+00> : vector<128x32xf32>
    %4 = tpu.matmul %2, %3, %cst {dimension_numbers = #tpu.dot_dimension_numbers<[1], [0], [0], [1], [0, 0, 1, 1], [], []>} : vector<128x16xbf16>, vector<16x32xbf16>, vector<128x32xf32> -> vector<128x32xf32>
    %c0_4 = arith.constant 0 : index
    %c0_5 = arith.constant 0 : index
    %5 = vector.load %arg4[%c0_4, %c0_5] : memref<1x32xf32, #tpu.memory_space<vmem>>, vector<1x32xf32>
    %6 = vector.broadcast %5 : vector<1x32xf32> to vector<128x32xf32>
    %7 = arith.addf %4, %6 : vector<128x32xf32>
    %c0_6 = arith.constant 0 : index
    %c0_7 = arith.constant 0 : index
    %c0_8 = arith.constant 0 : index
    %8 = vector.load %arg5[%c0_6, %c0_7, %c0_8] : memref<1x128x32xf32, #tpu.memory_space<vmem>>, vector<1x128x32xf32>
    %9 = vector.shape_cast %8 : vector<1x128x32xf32> to vector<128x32xf32>
    %10 = vector.shape_cast %7 : vector<128x32xf32> to vector<1x128x32xf32>
    tpu.vector_store %arg5[%c0_6, %c0_7, %c0_8], %10 {strides = array<i32>} : memref<1x128x32xf32, #tpu.memory_space<vmem>>, vector<1x128x32xf32>,
    return
  }
  func.func @transform_0(%arg0: i32, %arg1: i32) -> (i32, i32, i32) {
    %c0_i32 = arith.constant 0 : i32
    %c0_i32_0 = arith.constant 0 : i32
    return %arg0, %arg1, %c0_i32 : i32, i32, i32
  }
  func.func @transform_1(%arg0: i32, %arg1: i32) -> (i32, i32) {
    %c0_i32 = arith.constant 0 : i32
    %c0_i32_0 = arith.constant 0 : i32
    %c0_i32_1 = arith.constant 0 : i32
    return %c0_i32, %c0_i32_0 : i32, i32
  }
  func.func @transform_2(%arg0: i32, %arg1: i32) -> (i32, i32) {
    %c0_i32 = arith.constant 0 : i32
    %c0_i32_0 = arith.constant 0 : i32
    %c0_i32_1 = arith.constant 0 : i32
    return %c0_i32, %c0_i32_0 : i32, i32
  }
  func.func @transform_3(%arg0: i32, %arg1: i32) -> (i32, i32, i32) {
    %c0_i32 = arith.constant 0 : i32
    %c0_i32_0 = arith.constant 0 : i32
    return %arg0, %arg1, %c0_i32 : i32, i32, i32
  }
}

</mosaic_0001>

<bundles_post_ra>
// kernel: tpu_custom_call.1
= control target key start
LH: loop header
LB: loop body
LE: loop exit
PB: predicated region body
PF: predicated region fallthrough
CT: control target
= control target key end

     0   :  { %s632_s12 = smov 0   ;;  %s634_s13 = smov 0   ;;  %s738_s0 = inlined_call_operand.vmem [shape: f32[2,256,16], index: 0, kind: input, shape index: {}]   ;;  %s739_s1 = inlined_call_operand.vmem [shape: bf16[16,32], index: 1, kind: input, shape index: {}]   ;;  %s740_s2 = inlined_call_operand.vmem [shape: f32[1,32], index: 2, kind: input, shape index: {}]   ;;  %s741_s3 = inlined_call_operand.vmem [shape: f32[2,256,32], index: 3, kind: output, shape index: {}]  }
   0x1   :  { %s636_s14 = smov 0   ;;  %s638_s15 = smov 0  }
   0x2   :  { %s640_s16 = smov 0  }
   0x3 LB: > { %s22_s17 = sadd.s32 1, %s602_s14  ;;  %s25_s18 = sadd.s32 1, %s606_s15  ;;  %s610_s16 = sphi %s640_s16, %s13_s16   ;;  %s606_s15 = sphi %s638_s15, %s745_s15   ;;  %s602_s14 = sphi %s636_s14, %s744_s14   ;;  %s598_s13 = sphi %s634_s13, %s743_s13   ;;  %s594_s12 = sphi %s632_s12, %s742_s12  }
   0x4   : > { %p23_p0 = scmp.ge.s32.totalorder %s22_s17, 2  ;;  %p483_p1 = scmp.ge.s32.totalorder %s610_s16, 1 }
   0x5   : > { %p158_p2 = scmp.lt.s32.totalorder %s610_s16, 5 }
   0x6   : > { %s747_s17 = smov (%p23_p0, %s22_s17), 0  ;;  %s749_s18 = smov (!%p23_p0, %s25_s18), %s606_s15 }
   0x7   : > { %p159_p3 = pnand %p483_p1, %p158_p2  ;;  %p27_p4 = scmp.ge.s32.totalorder %s749_s18, 2 }
   0x8   : > { %s484_s21 = sshll.u32 (!%p159_p3), %s594_s12, 4  ;;  %p191_p5 = scmp.lt.s32.totalorder (!%p159_p3), %s598_s13, 1 }
   0x9   : > { %s751_s18 = smov (%p27_p4, %s749_s18), 0  ;;  %162 = sbr.rel (%p159_p3) target bundleno = 234 (0xea), region = 32 }
   0xa   : > { %p193_p6 = scmp.lt.s32.totalorder (!%p159_p3), %s484_s21, 31 }
   0xe   : > { %v571_v0 = vld [vmem:[%s739_s1] sm:$0xff]   ;;  %s753_s13 = smov (!%p191_p5, %s598_s13), 1  ;;  %s755_s21 = smov (!%p193_p6, %s484_s21), 31  ;;  %vm250_vm0 = vcmask 130048   ;;  %vm372_vm1 = vcmask 261120  }
   0xf   : > { %511 = vmatprep.subr.bf16.mxu0 %v571_v0  ;;  %529 = vmatprep.subr.bf16.mxu1 %v571_v0  ;;  %s485_s22 = sshll.u32 %s753_s13, 5  ;;  %v490_v25 = vld [vmem:[%s740_s2] ss:$0 sm:$0xff] }
  0x10   : > { %512 = vmatpush3.bf16.msra.mxu0 %v571_v0  ;;  %530 = vmatpush3.bf16.msra.mxu1 %v571_v0  ;;  %s665_s23 = sadd.s32 %s485_s22, %s755_s21 }
  0x11   : > { %s486_s24 = sshll.u32 %s665_s23, 3 }
  0x12   : > { %s198_s27 = scalar_lea.vmem %s738_s0, %s486_s24  ;;  %s689_s5 = scalar_lea.vmem %s741_s3, %s486_s24 }
  0x13   : > { %v211_v1 = vld [vmem:[%s198_s27] sm:$0xff]  ;;  %v212_v2 = vld [vmem:[%s198_s27 + $0x8] sm:$0xff]  ;;  %v213_v6 = vld [vmem:[%s198_s27 + $0x10] sm:$0xff] }
  0x14   : > { %v219_v3 = vld [vmem:[%s198_s27 + $0x40] sm:$0xff]  ;;  %v227_v4 = vpack.c.bf16 %v212_v2, %v211_v1  ;;  %v220_v5 = vld [vmem:[%s198_s27 + $0x48] sm:$0xff]  ;;  %v214_v7 = vld [vmem:[%s198_s27 + $0x18] sm:$0xff] }
  0x15   : > { %v231_v8 = vpack.c.bf16 %v220_v5, %v219_v3  ;;  %v228_v9 = vpack.c.bf16 %v214_v7, %v213_v6  ;;  %v221_v10 = vld [vmem:[%s198_s27 + $0x50] sm:$0xff]  ;;  %v222_v11 = vld [vmem:[%s198_s27 + $0x58] sm:$0xff]  ;;  %v215_v12 = vld [vmem:[%s198_s27 + $0x20] sm:$0xff] }
  0x16   : > { %513 = vmatprep.mubr.msk.bf16.mxu0 %vm250_vm0, %v227_v4  ;;  %v232_v13 = vpack.c.bf16 %v222_v11, %v221_v10  ;;  %v216_v14 = vld [vmem:[%s198_s27 + $0x28] sm:$0xff]  ;;  %v223_v15 = vld [vmem:[%s198_s27 + $0x60] sm:$0xff]  ;;  %v217_v19 = vld [vmem:[%s198_s27 + $0x30] sm:$0xff] }
  0x17   : > { %v224_v16 = vld [vmem:[%s198_s27 + $0x68] sm:$0xff]  ;;  %521 = vmatprep.mubr.msk.bf16.mxu1 %vm250_vm0, %v231_v8  ;;  %514 = vmatmul.mubr.msk.bf16.vlgmr.msra.gmra.mxu0 %vm250_vm0, %v228_v9  ;;  %v229_v17 = vpack.c.bf16 %v216_v14, %v215_v12  ;;  %v218_v20 = vld [vmem:[%s198_s27 + $0x38] sm:$0xff]  ;;  %v225_v21 = vld [vmem:[%s198_s27 + $0x70] sm:$0xff] }
  0x18   : > { %v233_v18 = vpack.c.bf16 %v224_v16, %v223_v15  ;;  %522 = vmatmul.mubr.msk.bf16.vlgmr.msra.gmra.mxu1 %vm250_vm0, %v232_v13  ;;  %v226_v22 = vld [vmem:[%s198_s27 + $0x78] sm:$0xff]  ;;  %v230_v23 = vpack.c.bf16 %v218_v20, %v217_v19 }
  0x19   : > { %517 = vmatprep.mubr.msk.bf16.mxu0 %vm250_vm0, %v229_v17  ;;  %v234_v24 = vpack.c.bf16 %v226_v22, %v225_v21 }
  0x1a   : > { %525 = vmatprep.mubr.msk.bf16.mxu1 %vm250_vm0, %v233_v18 }
  0x1f   : > { %518 = vmatmul.mubr.msk.bf16.gmra.mxu0 %vm250_vm0, %v230_v23 }
  0x20   : > { %526 = vmatmul.mubr.msk.bf16.gmra.mxu1 %vm250_vm0, %v234_v24 }
  0xd7   : > { %v515_v26 = vpop.f32.mrf.mxu0 }
  0xd8   : > { %v318_v27 = vadd.f32 %v515_v26, %v490_v25  ;;  %v523_v28 = vpop.f32.mrf.mxu1 }
  0xd9   : > { %v350_v29 = vadd.f32 %v523_v28, %v490_v25  ;;  %v309_v30 = vpop.f32.mrf.mxu0 }
  0xda   : > { %375 = vst.msk [vmem:[%s689_s5 + $0x10] sm:$0xff] %vm372_vm1, %v318_v27  ;;  %v310_v31 = vadd.f32 %v490_v25, %v309_v30  ;;  %v341_v32 = vpop.f32.mrf.mxu1 }
  0xdb   : > { %383 = vst.msk [vmem:[%s689_s5 + $0x50] sm:$0xff] %vm372_vm1, %v350_v29  ;;  %v342_v33 = vadd.f32 %v490_v25, %v341_v32  ;;  %v516_v34 = vpop.f32.mrf.mxu0 }
  0xdc   : > { %373 = vst.msk [vmem:[%s689_s5] sm:$0xff] %vm372_vm1, %v310_v31  ;;  %v321_v35 = vadd.f32 %v516_v34, %v490_v25  ;;  %v524_v36 = vpop.f32.mrf.mxu1 }
  0xdd   : > { %381 = vst.msk [vmem:[%s689_s5 + $0x40] sm:$0xff] %vm372_vm1, %v342_v33  ;;  %v353_v37 = vadd.f32 %v524_v36, %v490_v25  ;;  %v312_v38 = vpop.f32.mrf.mxu0 }
  0xde   : > { %376 = vst.msk [vmem:[%s689_s5 + $0x18] sm:$0xff] %vm372_vm1, %v321_v35  ;;  %v313_v39 = vadd.f32 %v490_v25, %v312_v38  ;;  %v344_v40 = vpop.f32.mrf.mxu1 }
  0xdf   : > { %384 = vst.msk [vmem:[%s689_s5 + $0x58] sm:$0xff] %vm372_vm1, %v353_v37  ;;  %v345_v41 = vadd.f32 %v490_v25, %v344_v40  ;;  %v519_v42 = vpop.f32.mrf.mxu0 }
  0xe0   : > { %374 = vst.msk [vmem:[%s689_s5 + $0x8] sm:$0xff] %vm372_vm1, %v313_v39  ;;  %v334_v43 = vadd.f32 %v519_v42, %v490_v25  ;;  %v527_v44 = vpop.f32.mrf.mxu1 }
  0xe1   : > { %382 = vst.msk [vmem:[%s689_s5 + $0x48] sm:$0xff] %vm372_vm1, %v345_v41  ;;  %v366_v45 = vadd.f32 %v527_v44, %v490_v25  ;;  %v325_v46 = vpop.f32.mrf.mxu0 }
  0xe2   : > { %379 = vst.msk [vmem:[%s689_s5 + $0x30] sm:$0xff] %vm372_vm1, %v334_v43  ;;  %v326_v47 = vadd.f32 %v490_v25, %v325_v46  ;;  %v357_v48 = vpop.f32.mrf.mxu1 }
  0xe3   : > { %387 = vst.msk [vmem:[%s689_s5 + $0x70] sm:$0xff] %vm372_vm1, %v366_v45  ;;  %v358_v49 = vadd.f32 %v490_v25, %v357_v48  ;;  %v520_v50 = vpop.f32.mrf.mxu0 }
  0xe4   : > { %377 = vst.msk [vmem:[%s689_s5 + $0x20] sm:$0xff] %vm372_vm1, %v326_v47  ;;  %v337_v51 = vadd.f32 %v520_v50, %v490_v25  ;;  %v528_v52 = vpop.f32.mrf.mxu1 }
  0xe5   : > { %385 = vst.msk [vmem:[%s689_s5 + $0x60] sm:$0xff] %vm372_vm1, %v358_v49  ;;  %v369_v53 = vadd.f32 %v528_v52, %v490_v25  ;;  %v328_v54 = vpop.f32.mrf.mxu0 }
  0xe6   : > { %380 = vst.msk [vmem:[%s689_s5 + $0x38] sm:$0xff] %vm372_vm1, %v337_v51  ;;  %v329_v55 = vadd.f32 %v490_v25, %v328_v54  ;;  %v360_v56 = vpop.f32.mrf.mxu1 }
  0xe7   : > { %388 = vst.msk [vmem:[%s689_s5 + $0x78] sm:$0xff] %vm372_vm1, %v369_v53  ;;  %v361_v57 = vadd.f32 %v490_v25, %v360_v56 }
  0xe8   : > { %378 = vst.msk [vmem:[%s689_s5 + $0x28] sm:$0xff] %vm372_vm1, %v329_v55 }
  0xe9   : > { %386 = vst.msk [vmem:[%s689_s5 + $0x68] sm:$0xff] %vm372_vm1, %v361_v57 }
  0xea PF: > { %s13_s16 = sadd.s32 1, %s610_s16   ;;  %s742_s12 = smov %s602_s14 }
  0xeb   : > { %p10_p7 = scmp.ge.s32.totalorder %s13_s16, 6   ;;  %s743_s13 = smov %s606_s15 }
  0xec   : > { %s744_s14 = smov %s747_s17  ;;  %s745_s15 = smov %s751_s18 }
  0xed   :  { %12 = sbr.rel (!%p10_p7) target bundleno = 3 (0x3), region = 62 }

</bundles_post_ra>
